<compile_context>
chip_gen: v6e
topology: v6e:2x2x1
jax: 0.10.0
libtpu: 0.0.40
codegen_flags: <defaults>
</compile_context>

<pallas_src>
import functools

import jax
import jax.numpy as jnp
from jax import lax
from jax.experimental import pallas as pl
from jax.experimental.pallas import tpu as pltpu


def _round_up(x, m):
    return (x + m - 1) // m * m


def _fused_mlp_kernel(*refs, num_layers, compute_dtype, vpu_final):
    """refs = (x_ref, w0, b0, w1, b1, ..., w_{L-1}, b_{L-1}, out_ref).

      x_ref   : [TILE_N, din]      natural point layout (no wrapper transpose)
      w0      : [d0, din]          f32 (input-coordinate precision kept)
      w_l     : [d_l, d_{l-1}]     compute_dtype (bf16 MXU operands by default)
      w_{L-1} : [d_{L-2}, 1]       f32 column when vpu_final (final proj on VPU/XLU)
      b_l     : [d_l, 1]           f32
      out_ref : [d_{L-1}, TILE_N]  lane-dense (N on lanes)
    """
    x_ref = refs[0]
    out_ref = refs[-1]

    # ---- layer 0: contract din against x's LAST axis (einsum 'od,nd->on');
    # the N->lanes relayout happens in-kernel, not as an extra HBM pass.
    # Kept in f32 (K=3, so its MXU cost is negligible).
    w0 = refs[1][...]
    b0 = refs[2][...]
    h = lax.dot_general(
        w0, x_ref[...],
        dimension_numbers=(((1,), (1,)), ((), ())),
        preferred_element_type=jnp.float32,
    ) + b0                                               # [d0, TILE_N] f32

    if num_layers == 1:
        out_ref[...] = h.astype(out_ref.dtype)
        return
    h = jnp.maximum(h, 0.0)

    for l in range(1, num_layers):
        w = refs[1 + 2 * l][...]
        b = refs[2 + 2 * l][...]
        is_last = l == num_layers - 1
        if is_last and vpu_final:
            # dim_out == 1: keep this M=1 "matmul" off the MXU.  Broadcast-mul
            # on the VPU + sublane reduce on the XLU, all f32 (v5e has no bf16
            # VPU path; the epilogue stays f32 on every generation).
            y = jnp.sum(h * w, axis=0, keepdims=True) + b      # [1, TILE_N]
        else:
            # MXU matmul: low-precision operands, f32 accumulation,
            # f32 bias/ReLU epilogue.
            y = jnp.dot(w, h.astype(compute_dtype),
                        preferred_element_type=jnp.float32) + b
        h = y if is_last else jnp.maximum(y, 0.0)

    out_ref[...] = h.astype(out_ref.dtype)


def fold_weight_norm(params):
    """Fold weight_norm (torch default dim=0 for Linear) once, outside the hot path.

    NOTE: like torch, there is no epsilon — an all-zero weight row gives NaN/Inf.
    """
    folded = []
    for v, g, b in params:
        norm = jnp.sqrt(jnp.sum(v * v, axis=1, keepdims=True))
        w = v * (g[:, None] / norm)            # effective weight, [dout, din]
        folded.append((w, b.reshape(-1, 1)))   # bias as a column for W @ x + b
    return folded


def mlp_forward(x, folded_params, *, compute_dtype=jnp.bfloat16, tile_n=8192):
    """x: [N, dim_in] -> [N, dim_out]; one fused Pallas kernel for the whole MLP."""
    n, din = x.shape
    num_layers = len(folded_params)
    dout = folded_params[-1][0].shape[0]
    out_dtype = x.dtype
    vpu_final = num_layers > 1 and dout == 1

    # Pad N only to the 128-lane granule (NOT to a tile multiple): the ragged
    # last grid block is handled by Pallas' masked boundary DMA.
    n_pad = _round_up(max(n, 128), 128)
    # Cap the tile so the grid keeps >= 2 steps when possible (v7x has 2 TCs and
    # the "parallel" axis only shards if there are >= 2 steps); otherwise use
    # big tiles to amortize the ~0.35us per-grid-step overhead.
    half = _round_up(max(n_pad // 2, 128), 128)
    tile = max(128, min(tile_n, half))
    grid = (pl.cdiv(n_pad, tile),)

    # Layer-0 input stays f32 even on the bf16 path (SDF coordinate precision).
    x_in = x.astype(jnp.float32)
    if n_pad != n:
        x_in = jnp.zeros((n_pad, din), jnp.float32).at[:n, :].set(x_in)

    flat_params = []
    in_specs = [pl.BlockSpec((tile, din), lambda i: (i, 0))]
    for l, (w, b) in enumerate(folded_params):
        is_last = l == num_layers - 1
        if l == 0:
            w_k = w.astype(jnp.float32)               # layer-0 weight in f32
        elif is_last and vpu_final:
            w_k = w.astype(jnp.float32).T             # [d_hidden, 1] f32 column (VPU path)
        else:
            w_k = w.astype(compute_dtype)             # bf16 MXU operands by default
        b_k = b.astype(jnp.float32)                   # f32 bias column
        flat_params += [w_k, b_k]
        # Constant index maps -> weights/biases stay VMEM-resident across the grid.
        in_specs += [pl.BlockSpec(w_k.shape, lambda i: (0, 0)),
                     pl.BlockSpec(b_k.shape, lambda i: (0, 0))]

    kernel = functools.partial(
        _fused_mlp_kernel, num_layers=num_layers,
        compute_dtype=compute_dtype, vpu_final=vpu_final)

    outT = pl.pallas_call(
        kernel,
        out_shape=jax.ShapeDtypeStruct((dout, n_pad), out_dtype),
        grid=grid,
        in_specs=in_specs,
        out_specs=pl.BlockSpec((dout, tile), lambda i: (0, i)),
        compiler_params=pltpu.CompilerParams(
            # N axis is embarrassingly parallel -> shard across TensorCores.
            dimension_semantics=("parallel",),
            # Room for big tiles (input block lane-padding + activation scratch);
            # well under v7x's 64 MiB physical VMEM.
            vmem_limit_bytes=32 * 1024 * 1024,
        ),
    )(x_in, *flat_params)

    return outT[:, :n].T          # tiny [dout, n] -> [n, dout] relayout


mlp_forward_jit = jax.jit(mlp_forward, static_argnames=("compute_dtype", "tile_n"))


def init_mlp_params(key, dim_in, dim_out, dim_hidden, num_layers):
    """Deterministic synthetic params mirroring nn.Linear + weight_norm shapes."""
    params = []
    for l in range(num_layers):
        din = dim_in if l == 0 else dim_hidden
        dout = dim_out if l == num_layers - 1 else dim_hidden
        key, kv, kg, kb = jax.random.split(key, 4)
        bound = 1.0 / jnp.sqrt(jnp.float32(din))
        v = jax.random.uniform(kv, (dout, din), jnp.float32, -bound, bound)  # weight_v
        g = jax.random.uniform(kg, (dout,), jnp.float32, 0.5, 1.5)           # weight_g
        b = jax.random.uniform(kb, (dout,), jnp.float32, -bound, bound)      # bias
        params.append((v, g, b))
    return params


def mlp_reference(x, params):
    """Pure-JAX reference of the same forward pass."""
    num_layers = len(params)
    for l, (v, g, b) in enumerate(params):
        norm = jnp.sqrt(jnp.sum(v * v, axis=1, keepdims=True))
        w = v * (g[:, None] / norm)
        x = x @ w.T + b
        if l != num_layers - 1:
            x = jnp.maximum(x, 0.0)
    return x


if __name__ == "__main__":
    # SDF-style MLP: dim_in=3, dim_hidden=32, dim_out=1, num_layers=3.
    dim_in, dim_out, dim_hidden, num_layers = 3, 1, 32, 3

    key = jax.random.PRNGKey(0)
    key, kx, kx_big = jax.random.split(key, 3)
    params = init_mlp_params(key, dim_in, dim_out, dim_hidden, num_layers)
    folded = fold_weight_norm(params)   # weight_norm folded once, outside the hot path

    # --- small case: 16 points (single 128-lane tile), default bf16 path -----
    x_small = jax.random.normal(kx, (16, dim_in), dtype=jnp.float32)
    ref_small = mlp_reference(x_small, params)
    out_small = jax.block_until_ready(mlp_forward_jit(x_small, folded))
    assert out_small.shape == (16, dim_out)
    assert jnp.allclose(out_small, ref_small, atol=5e-2, rtol=5e-2)

    # --- larger case: 2048 points -> tile capped to 1024 so the 'parallel'
    #     grid keeps 2 steps (both v7x TensorCores busy) --------------------
    x_big = jax.random.normal(kx_big, (2048, dim_in), dtype=jnp.float32)
    ref_big = mlp_reference(x_big, params)

    # default path: bf16 hidden-matmul operands, f32 layer-0 / accum / epilogue
    out_bf16 = jax.block_until_ready(mlp_forward_jit(x_big, folded))
    assert out_bf16.shape == (2048, dim_out)
    assert jnp.allclose(out_bf16, ref_big, atol=5e-2, rtol=5e-2)

    # full-f32 knob: tight correctness on all generations
    out_f32 = jax.block_until_ready(
        mlp_forward_jit(x_big, folded, compute_dtype=jnp.float32))
    assert out_f32.shape == (2048, dim_out)
    assert jnp.allclose(out_f32, ref_big, atol=1e-5, rtol=1e-5)

    # ragged grid: tile (768) does not divide padded N (2048) -> masked last block
    out_rag = jax.block_until_ready(
        mlp_forward_jit(x_big, folded, compute_dtype=jnp.float32, tile_n=768))
    assert jnp.allclose(out_rag, ref_big, atol=1e-5, rtol=1e-5)

    print("KERNEL_OK")
</pallas_src>

<mosaic_0001>
module attributes {stable_mosaic.version = 11 : i64} {
  func.func @_fused_mlp_kernel(%arg0: i32, %arg1: memref<128x3xf32, #tpu.memory_space<vmem>>, %arg2: memref<32x3xf32, #tpu.memory_space<vmem>>, %arg3: memref<32x1xf32, #tpu.memory_space<vmem>>, %arg4: memref<32x32xbf16, #tpu.memory_space<vmem>>, %arg5: memref<32x1xf32, #tpu.memory_space<vmem>>, %arg6: memref<32x1xf32, #tpu.memory_space<vmem>>, %arg7: memref<1x1xf32, #tpu.memory_space<vmem>>, %arg8: memref<1x128xf32, #tpu.memory_space<vmem>>) attributes {dimension_semantics = [#tpu.dimension_semantics<parallel>], iteration_bounds = array<i64: 1>, scalar_prefetch = 0 : i64, scratch_operands = 0 : i64, tpu.core_type = #tpu.core_type<tc>, window_params = [{transform_indices = @transform_0, window_bounds = array<i64: 128, 3>}, {pipeline_mode = #tpu.pipeline_mode<synchronous>, transform_indices = @transform_1, window_bounds = array<i64: 32, 3>}, {pipeline_mode = #tpu.pipeline_mode<synchronous>, transform_indices = @transform_2, window_bounds = array<i64: 32, 1>}, {pipeline_mode = #tpu.pipeline_mode<synchronous>, transform_indices = @transform_3, window_bounds = array<i64: 32, 32>}, {pipeline_mode = #tpu.pipeline_mode<synchronous>, transform_indices = @transform_4, window_bounds = array<i64: 32, 1>}, {pipeline_mode = #tpu.pipeline_mode<synchronous>, transform_indices = @transform_5, window_bounds = array<i64: 32, 1>}, {pipeline_mode = #tpu.pipeline_mode<synchronous>, transform_indices = @transform_6, window_bounds = array<i64: 1, 1>}, {transform_indices = @transform_7, window_bounds = array<i64: 1, 128>}]} {
    %c0 = arith.constant 0 : index
    %c0_0 = arith.constant 0 : index
    %0 = vector.load %arg2[%c0, %c0_0] : memref<32x3xf32, #tpu.memory_space<vmem>>, vector<32x3xf32>
    %c0_1 = arith.constant 0 : index
    %c0_2 = arith.constant 0 : index
    %1 = vector.load %arg3[%c0_1, %c0_2] : memref<32x1xf32, #tpu.memory_space<vmem>>, vector<32x1xf32>
    %c0_3 = arith.constant 0 : index
    %c0_4 = arith.constant 0 : index
    %2 = vector.load %arg1[%c0_3, %c0_4] : memref<128x3xf32, #tpu.memory_space<vmem>>, vector<128x3xf32>
    %cst = arith.constant dense<0.000000e+00> : vector<32x128xf32>
    %3 = tpu.matmul %0, %2, %cst {dimension_numbers = #tpu.dot_dimension_numbers<[1], [1], [0], [0], [0, 0, 1, 0], [], []>} : vector<32x3xf32>, vector<128x3xf32>, vector<32x128xf32> -> vector<32x128xf32>
    %4 = vector.broadcast %1 : vector<32x1xf32> to vector<32x128xf32>
    %5 = arith.addf %3, %4 : vector<32x128xf32>
    %cst_5 = arith.constant 0.000000e+00 : f32
    %6 = vector.broadcast %cst_5 : f32 to vector<32x128xf32>
    %7 = arith.maximumf %5, %6 : vector<32x128xf32>
    %c0_6 = arith.constant 0 : index
    %c0_7 = arith.constant 0 : index
    %8 = vector.load %arg4[%c0_6, %c0_7] : memref<32x32xbf16, #tpu.memory_space<vmem>>, vector<32x32xbf16>
    %c0_8 = arith.constant 0 : index
    %c0_9 = arith.constant 0 : index
    %9 = vector.load %arg5[%c0_8, %c0_9] : memref<32x1xf32, #tpu.memory_space<vmem>>, vector<32x1xf32>
    %10 = arith.truncf %7 : vector<32x128xf32> to vector<32x128xbf16>
    %cst_10 = arith.constant dense<0.000000e+00> : vector<32x128xf32>
    %11 = tpu.matmul %8, %10, %cst_10 {dimension_numbers = #tpu.dot_dimension_numbers<[1], [0], [0], [1], [0, 0, 1, 1], [], []>} : vector<32x32xbf16>, vector<32x128xbf16>, vector<32x128xf32> -> vector<32x128xf32>
    %12 = vector.broadcast %9 : vector<32x1xf32> to vector<32x128xf32>
    %13 = arith.addf %11, %12 : vector<32x128xf32>
    %cst_11 = arith.constant 0.000000e+00 : f32
    %14 = vector.broadcast %cst_11 : f32 to vector<32x128xf32>
    %15 = arith.maximumf %13, %14 : vector<32x128xf32>
    %c0_12 = arith.constant 0 : index
    %c0_13 = arith.constant 0 : index
    %16 = vector.load %arg6[%c0_12, %c0_13] : memref<32x1xf32, #tpu.memory_space<vmem>>, vector<32x1xf32>
    %c0_14 = arith.constant 0 : index
    %c0_15 = arith.constant 0 : index
    %17 = vector.load %arg7[%c0_14, %c0_15] : memref<1x1xf32, #tpu.memory_space<vmem>>, vector<1x1xf32>
    %18 = vector.broadcast %16 : vector<32x1xf32> to vector<32x128xf32>
    %19 = arith.mulf %15, %18 : vector<32x128xf32>
    %cst_16 = arith.constant dense<0.000000e+00> : vector<128xf32>
    %20 = vector.multi_reduction <add>, %19, %cst_16 [0] : vector<32x128xf32> to vector<128xf32>
    %21 = vector.shape_cast %20 : vector<128xf32> to vector<1x128xf32>
    %22 = vector.broadcast %17 : vector<1x1xf32> to vector<1x128xf32>
    %23 = arith.addf %21, %22 : vector<1x128xf32>
    %c0_17 = arith.constant 0 : index
    %c0_18 = arith.constant 0 : index
    %24 = vector.load %arg8[%c0_17, %c0_18] : memref<1x128xf32, #tpu.memory_space<vmem>>, vector<1x128xf32>
    tpu.vector_store %arg8[%c0_17, %c0_18], %23 {strides = array<i32>} : memref<1x128xf32, #tpu.memory_space<vmem>>, vector<1x128xf32>,
    return
  }
  func.func @transform_0(%arg0: i32) -> (i32, i32) {
    %c0_i32 = arith.constant 0 : i32
    %c0_i32_0 = arith.constant 0 : i32
    return %arg0, %c0_i32 : i32, i32
  }
  func.func @transform_1(%arg0: i32) -> (i32, i32) {
    %c0_i32 = arith.constant 0 : i32
    %c0_i32_0 = arith.constant 0 : i32
    %c0_i32_1 = arith.constant 0 : i32
    return %c0_i32, %c0_i32_0 : i32, i32
  }
  func.func @transform_2(%arg0: i32) -> (i32, i32) {
    %c0_i32 = arith.constant 0 : i32
    %c0_i32_0 = arith.constant 0 : i32
    %c0_i32_1 = arith.constant 0 : i32
    return %c0_i32, %c0_i32_0 : i32, i32
  }
  func.func @transform_3(%arg0: i32) -> (i32, i32) {
    %c0_i32 = arith.constant 0 : i32
    %c0_i32_0 = arith.constant 0 : i32
    %c0_i32_1 = arith.constant 0 : i32
    return %c0_i32, %c0_i32_0 : i32, i32
  }
  func.func @transform_4(%arg0: i32) -> (i32, i32) {
    %c0_i32 = arith.constant 0 : i32
    %c0_i32_0 = arith.constant 0 : i32
    %c0_i32_1 = arith.constant 0 : i32
    return %c0_i32, %c0_i32_0 : i32, i32
  }
  func.func @transform_5(%arg0: i32) -> (i32, i32) {
    %c0_i32 = arith.constant 0 : i32
    %c0_i32_0 = arith.constant 0 : i32
    %c0_i32_1 = arith.constant 0 : i32
    return %c0_i32, %c0_i32_0 : i32, i32
  }
  func.func @transform_6(%arg0: i32) -> (i32, i32) {
    %c0_i32 = arith.constant 0 : i32
    %c0_i32_0 = arith.constant 0 : i32
    %c0_i32_1 = arith.constant 0 : i32
    return %c0_i32, %c0_i32_0 : i32, i32
  }
  func.func @transform_7(%arg0: i32) -> (i32, i32) {
    %c0_i32 = arith.constant 0 : i32
    %c0_i32_0 = arith.constant 0 : i32
    return %c0_i32, %arg0 : i32, i32
  }
}

</mosaic_0001>

<bundles_post_ra>
// kernel: mlp_forward.1
= control target key start
LH: loop header
LB: loop body
LE: loop exit
PB: predicated region body
PF: predicated region fallthrough
CT: control target
= control target key end

     0   :  { %vm73_vm0 = vcmask 23552   ;;  %v475_v2 = vmov 0   ;;  %vm263_vm1 = vcmask 261120   ;;  %s662_s0 = inlined_call_operand.vmem [shape: f32[128,3], index: 0, kind: input, shape index: {}]   ;;  %s663_s6 = inlined_call_operand.<no memory space> [shape: f32[1,1], index: 6, kind: input, shape index: {}]   ;;  %s664_s1 = inlined_call_operand.vmem [shape: f32[32,3], index: 1, kind: input, shape index: {}]   ;;  %s665_s2 = inlined_call_operand.vmem [shape: f32[32,1], index: 2, kind: input, shape index: {}]   ;;  %s666_s4 = inlined_call_operand.vmem [shape: f32[32,1], index: 4, kind: input, shape index: {}]   ;;  %s667_s5 = inlined_call_operand.vmem [shape: f32[32,1], index: 5, kind: input, shape index: {}]   ;;  %s668_s3 = inlined_call_operand.vmem [shape: bf16[32,32], index: 3, kind: input, shape index: {}]   ;;  %s669_s7 = inlined_call_operand.vmem [shape: f32[1,128], index: 7, kind: output, shape index: {}]  }
   0x1   :  { %v52_v0 = vld [vmem:[%s662_s0 + $0x78] sm:$0xff]  ;;  %v51_v1 = vld [vmem:[%s662_s0 + $0x70] sm:$0xff]  ;;  %471 = vset.pattern.permute.xlu0 %v475_v2  ;;  %472 = vset.pattern.permute.xlu1 %v475_v2  ;;  %v12_v3 = vstv %s663_s6  ;;  %v50_v4 = vld [vmem:[%s662_s0 + $0x68] sm:$0xff] }
   0x2   :  { %424 = vmatprep.subr.msk.mxu0 %vm73_vm0, %v52_v0  ;;  %13 = vst [vmem:[#allocation2] sm:$0x1] %v12_v3  ;;  %v29_v5 = vld [vmem:[%s664_s1] sm:$0xff]  ;;  %v35_v6 = vld [vmem:[%s665_s2 + $0x10] sm:$0xff]  ;;  %v36_v9 = vld [vmem:[%s665_s2 + $0x18] sm:$0xff] }
   0x3   :  { %425 = vmatpush3.xpose.msk.msra.mxu0 %vm73_vm0, %v52_v0  ;;  %456 = vmatprep.mubr.msk.f32.mxu0 %vm73_vm0, %v29_v5  ;;  %v33_v7 = vld [vmem:[%s665_s2] sm:$0xff]  ;;  %v34_v10 = vld [vmem:[%s665_s2 + $0x8] sm:$0xff]  ;;  %v48_v11 = vld [vmem:[%s662_s0 + $0x58] sm:$0xff] }
   0x4   :  { %426 = vmatprep.subr.msk.mxu0 %vm73_vm0, %v51_v1  ;;  %65 = vperm.xlu0 %471, %v35_v6   ;;  %v49_v8 = vld [vmem:[%s662_s0 + $0x60] sm:$0xff]  ;;  %v228_v13 = vld [vmem:[%s666_s4 + $0x8] sm:$0xff]  ;;  %v47_v14 = vld [vmem:[%s662_s0 + $0x50] sm:$0xff] }
   0x5   :  { %55 = vperm.xlu1 %472, %v33_v7   ;;  %v227_v12 = vld [vmem:[%s666_s4] sm:$0xff]  ;;  %v229_v15 = vld [vmem:[%s666_s4 + $0x10] sm:$0xff]  ;;  %v230_v16 = vld [vmem:[%s666_s4 + $0x18] sm:$0xff] }
   0x6   :  { %v46_v17 = vld [vmem:[%s662_s0 + $0x48] sm:$0xff]  ;;  %v323_v18 = vld [vmem:[%s667_s5] sm:$0xff]  ;;  %v325_v21 = vld [vmem:[%s667_s5 + $0x10] sm:$0xff] }
   0x7   :  { %427 = vmatpush3.xpose.msk.msra.mxu0 %vm73_vm0, %v51_v1  ;;  %v324_v19 = vld [vmem:[%s667_s5 + $0x8] sm:$0xff]  ;;  %v45_v20 = vld [vmem:[%s662_s0 + $0x40] sm:$0xff]  ;;  %v326_v22 = vld [vmem:[%s667_s5 + $0x18] sm:$0xff] }
   0x8   :  { %428 = vmatprep.subr.msk.mxu0 %vm73_vm0, %v50_v4  ;;  %70 = vperm.xlu0 %471, %v36_v9   ;;  %v44_v23 = vld [vmem:[%s662_s0 + $0x38] sm:$0xff]  ;;  %v43_v25 = vld [vmem:[%s662_s0 + $0x30] sm:$0xff]  ;;  %v42_v26 = vld [vmem:[%s662_s0 + $0x28] sm:$0xff] }
   0x9   :  { %60 = vperm.xlu1 %472, %v34_v10   ;;  %v327_v24 = vld [vmem:[#allocation2] sm:$0x1]  ;;  %v40_v28 = vld [vmem:[%s662_s0 + $0x18] sm:$0xff]  ;;  %v39_v29 = vld [vmem:[%s662_s0 + $0x10] sm:$0xff] }
   0xa   :  { %v41_v27 = vld [vmem:[%s662_s0 + $0x20] sm:$0xff]  ;;  %v38_v30 = vld [vmem:[%s662_s0 + $0x8] sm:$0xff]  ;;  %v31_v33 = vld [vmem:[%s664_s1 + $0x10] sm:$0xff] }
   0xb   :  { %429 = vmatpush3.xpose.msk.msra.mxu0 %vm73_vm0, %v50_v4  ;;  %v37_v31 = vld [vmem:[%s662_s0] sm:$0xff]  ;;  %v30_v32 = vld [vmem:[%s664_s1 + $0x8] sm:$0xff]  ;;  %v32_v34 = vld [vmem:[%s664_s1 + $0x18] sm:$0xff] }
   0xc   :  { %430 = vmatprep.subr.msk.mxu0 %vm73_vm0, %v49_v8  ;;  %235 = vperm.xlu0 %471, %v227_v12   ;;  %v473_v35 = vld [vmem:[%s668_s3] sm:$0xff]   ;;  %v474_v54 = vld [vmem:[%s668_s3 + $0x8] sm:$0xff]  }
   0xd   :  { %240 = vperm.xlu1 %472, %v228_v13   ;;  %466 = vmatprep.mubr.msk.bf16.mxu1 %vm263_vm1, %v473_v35 }
   0xf   :  { %431 = vmatpush3.xpose.msk.msra.mxu0 %vm73_vm0, %v49_v8 }
  0x10   :  { %432 = vmatprep.subr.msk.mxu0 %vm73_vm0, %v48_v11  ;;  %245 = vperm.xlu0 %471, %v229_v15  }
  0x11   :  { %250 = vperm.xlu1 %472, %v230_v16  }
  0x13   :  { %433 = vmatpush3.xpose.msk.msra.mxu0 %vm73_vm0, %v48_v11 }
  0x14   :  { %434 = vmatprep.subr.msk.mxu0 %vm73_vm0, %v47_v14  ;;  %330 = vperm.xlu0 %471, %v323_v18  }
  0x15   :  { %335 = vperm.xlu1 %472, %v324_v19  }
  0x17   :  { %435 = vmatpush3.xpose.msk.msra.mxu0 %vm73_vm0, %v47_v14 }
  0x18   :  { %436 = vmatprep.subr.msk.mxu0 %vm73_vm0, %v46_v17  ;;  %340 = vperm.xlu0 %471, %v325_v21  }
  0x19   :  { %345 = vperm.xlu1 %472, %v326_v22  }
  0x1b   :  { %437 = vmatpush3.xpose.msk.msra.mxu0 %vm73_vm0, %v46_v17  ;;  %v366_v17 = vlaneseq }
  0x1c   :  { %438 = vmatprep.subr.msk.mxu0 %vm73_vm0, %v45_v20  ;;  %363 = vperm.xlu0 %471, %v327_v24  }
  0x1f   :  { %439 = vmatpush3.xpose.msk.msra.mxu0 %vm73_vm0, %v45_v20  ;;  %v367_v20 = vshrl.u32 %v366_v17, 7 }
  0x20   :  { %440 = vmatprep.subr.msk.mxu0 %vm73_vm0, %v44_v23 }
  0x23   :  { %441 = vmatpush3.xpose.msk.msra.mxu0 %vm73_vm0, %v44_v23  ;;  %v368_v23 = vsub.s32 0, %v367_v20 }
  0x24   :  { %442 = vmatprep.subr.msk.mxu0 %vm73_vm0, %v43_v25 }
  0x27   :  { %443 = vmatpush3.xpose.msk.msra.mxu0 %vm73_vm0, %v43_v25 }
  0x28   :  { %444 = vmatprep.subr.msk.mxu0 %vm73_vm0, %v42_v26 }
  0x2b   :  { %445 = vmatpush3.xpose.msk.msra.mxu0 %vm73_vm0, %v42_v26 }
  0x2c   :  { %446 = vmatprep.subr.msk.mxu0 %vm73_vm0, %v41_v27 }
  0x2f   :  { %447 = vmatpush3.xpose.msk.msra.mxu0 %vm73_vm0, %v41_v27 }
  0x30   :  { %448 = vmatprep.subr.msk.mxu0 %vm73_vm0, %v40_v28 }
  0x33   :  { %449 = vmatpush3.xpose.msk.msra.mxu0 %vm73_vm0, %v40_v28 }
  0x34   :  { %450 = vmatprep.subr.msk.mxu0 %vm73_vm0, %v39_v29 }
  0x37   :  { %451 = vmatpush3.xpose.msk.msra.mxu0 %vm73_vm0, %v39_v29 }
  0x38   :  { %452 = vmatprep.subr.msk.mxu0 %vm73_vm0, %v38_v30 }
  0x3b   :  { %453 = vmatpush3.xpose.msk.msra.mxu0 %vm73_vm0, %v38_v30 }
  0x3c   :  { %454 = vmatprep.subr.msk.mxu0 %vm73_vm0, %v37_v31 }
  0x3f   :  { %455 = vmatpush3.xpose.msk.msra.mxu0 %vm73_vm0, %v37_v31 }
  0x42   :  { %457 = vmatmul.mubr.msk.f32.vlgmr.msra.gmra.mxu0 %vm73_vm0, %v30_v32 }
  0x43   :  { %459 = vmatprep.mubr.msk.f32.mxu0 %vm73_vm0, %v31_v33 }
  0x46   :  { %460 = vmatmul.mubr.msk.f32.gmra.mxu0 %vm73_vm0, %v32_v34 }
  0x7f   :  { %v66_v36 = vpop.permute.xlu0 %65 }
  0x80   :  { %v56_v37 = vpop.permute.xlu1 %55 }
  0x83   :  { %v71_v40 = vpop.permute.xlu0 %70 }
  0x84   :  { %v61_v44 = vpop.permute.xlu1 %60 }
  0x87   :  { %v236_v55 = vpop.permute.xlu0 %235 }
  0x88   :  { %v241_v56 = vpop.permute.xlu1 %240 }
  0x8b   :  { %v246_v57 = vpop.permute.xlu0 %245 }
  0x8c   :  { %v251_v59 = vpop.permute.xlu1 %250 }
  0x8f   :  { %v331_v0 = vpop.permute.xlu0 %330 }
  0x90   :  { %v336_v5 = vpop.permute.xlu1 %335 }
  0x93   :  { %v341_v11 = vpop.permute.xlu0 %340 }
  0x94   :  { %v346_v14 = vpop.permute.xlu1 %345 }
  0x97   :  { %v364_v25 = vpop.permute.xlu0 %363 }
  0x98   :  { %v369_v27 = vrot.slane %v364_v25, %v368_v23 }
 0x102   :  { %v458_v38 = vpop.f32.mrf.mxu0 }
 0x103   :  { %v206_v46 = vadd.f32 %v458_v38, %v61_v44 }
 0x104   :  { %v200_v39 = vpop.f32.mrf.mxu0 }
 0x105   :  { %v201_v42 = vadd.f32 %v200_v39, %v56_v37  ;;  %v220_v51 = vmax.f32 %v206_v46, 0.0 }
 0x106   :  { %v461_v41 = vpop.f32.mrf.mxu0 }
 0x107   :  { %v216_v43 = vadd.f32 %v461_v41, %v71_v40  ;;  %v219_v48 = vmax.f32 %v201_v42, 0.0 }
 0x108   :  { %v210_v45 = vpop.f32.mrf.mxu0 }
 0x109   :  { %v211_v47 = vadd.f32 %v210_v45, %v66_v36  ;;  %v222_v49 = vmax.f32 %v216_v43, 0.0  ;;  %v231_v53 = vpack.c.bf16 %v220_v51, %v219_v48 }
 0x10b   :  { %v221_v50 = vmax.f32 %v211_v47, 0.0 }
 0x10d   :  { %v232_v52 = vpack.c.bf16 %v222_v49, %v221_v50 }
 0x10f   :  { %462 = vmatprep.subr.bf16.mxu1 %v232_v52 }
 0x110   :  { %463 = vmatpush3.bf16.msra.mxu1 %v232_v52 }
 0x111   :  { %464 = vmatprep.subr.bf16.mxu1 %v231_v53 }
 0x114   :  { %465 = vmatpush3.bf16.msra.mxu1 %v231_v53 }
 0x117   :  { %467 = vmatmul.mubr.msk.bf16.vlgmr.msra.gmra.mxu1 %vm263_vm1, %v474_v54 }
 0x1d7   :  { %v468_v58 = vpop.f32.mrf.mxu1 }
 0x1d8   :  { %v313_v63 = vadd.f32 %v468_v58, %v246_v57 }
 0x1d9   :  { %v304_v60 = vpop.f32.mrf.mxu1 }
 0x1da   :  { %v305_v61 = vadd.f32 %v304_v60, %v236_v55  ;;  %v321_v6 = vmax.f32 %v313_v63, 0.0 }
 0x1db   :  { %v469_v62 = vpop.f32.mrf.mxu1 }
 0x1dc   :  { %v319_v2 = vmax.f32 %v305_v61, 0.0  ;;  %v316_v3 = vadd.f32 %v469_v62, %v251_v59  ;;  %v350_v12 = vmul.f32 %v341_v11, %v321_v6 }
 0x1dd   :  { %v307_v1 = vpop.f32.mrf.mxu1 }
 0x1de   :  { %v308_v4 = vadd.f32 %v307_v1, %v241_v56  ;;  %v348_v8 = vmul.f32 %v331_v0, %v319_v2  ;;  %v322_v9 = vmax.f32 %v316_v3, 0.0 }
 0x1e0   :  { %v320_v7 = vmax.f32 %v308_v4, 0.0  ;;  %v351_v15 = vmul.f32 %v346_v14, %v322_v9 }
 0x1e2   :  { %v349_v10 = vmul.f32 %v336_v5, %v320_v7 }
 0x1e4   :  { %v352_v13 = vadd.f32 %v349_v10, %v348_v8 }
 0x1e6   :  { %v353_v16 = vadd.f32 %v352_v13, %v350_v12 }
 0x1e8   :  { %v354_v18 = vadd.f32 %v353_v16, %v351_v15 }
 0x1ea   :  { %v355_v19 = vrot.slane %v354_v18, 4 }
 0x1ec   :  { %v356_v21 = vadd.f32 %v355_v19, %v354_v18 }
 0x1ee   :  { %v357_v22 = vrot.slane %v356_v21, 2 }
 0x1f0   :  { %v358_v24 = vadd.f32 %v357_v22, %v356_v21 }
 0x1f2   :  { %v359_v26 = vrot.slane %v358_v24, 1 }
 0x1f4   :  { %v360_v28 = vadd.f32 %v359_v26, %v358_v24 }
 0x1f6   :  { %v370_v29 = vadd.f32 %v369_v27, %v360_v28 }
 0x1f8   :  { %371 = vst [vmem:[%s669_s7] sm:$0x1] %v370_v29 }

</bundles_post_ra>
